<compile_context>
chip_gen: v6e
topology: v6e:2x2x1
jax: 0.10.0
libtpu: 0.0.40
codegen_flags: <defaults>
</compile_context>

<pallas_src>
import jax
import jax.numpy as jnp
from jax.experimental import pallas as pl
from jax.experimental.pallas import tpu as pltpu


def _round_up(v, m):
    return (v + m - 1) // m * m


def graph_resnet_kernel(x_ref, w_ref, a_ref, o_ref):
    """Fused GraphResNetBlock forward for one node-tile of the output.

    x_ref: [C, N]   full node features (grid-invariant)
    w_ref: [C, C]   GCNConv linear weight (grid-invariant)
    a_ref: [N, tn]  tile of the transposed normalized adjacency
    o_ref: [C, tn]  output tile
    """
    f32 = jnp.float32
    tn = o_ref.shape[-1]
    t0 = pl.multiple_of(pl.program_id(0) * tn, 128)   # first node of this tile

    x_full = x_ref[...].astype(f32)                                   # [C, N]
    a_tile = a_ref[...].astype(f32)                                   # [N, tn]

    # (1) propagate over the graph for this node tile (MXU):
    #     prop[:, i_loc] = sum_j x[:, j] * A_hat_T[j, t0 + i_loc]
    prop = jnp.dot(x_full, a_tile, preferred_element_type=f32)        # [C, tn]

    # (2) node-wise linear applied AFTER propagation (W @ X @ A == W @ (X @ A)).
    gcn = jnp.dot(w_ref[...].astype(f32), prop,
                  preferred_element_type=f32)                         # [C, tn]

    # (3) tanh + residual; residual is a 128-aligned slice of the resident x.
    residual = x_ref[:, pl.ds(t0, tn)].astype(f32)                    # [C, tn]
    o_ref[...] = (jnp.tanh(gcn) + residual).astype(o_ref.dtype)


def graph_resnet_block(x, w, edge_index, *, node_tile=256):
    """Forward pass: tanh(GCNConv(x, edge_index)) + x.

    x:          [C, N]  float node features (channels-first).
    w:          [C, C]  GCNConv linear weight, PyTorch layout [out, in], no bias.
    edge_index: [2, E]  int, row = sources, col = targets.
    node_tile:  output tile width along the node axis (multiple of 128).
                256 matches the v6e/v7x 256-wide MXU; use 128 on v5e.
    """
    C, N = x.shape
    assert w.shape == (C, C), "residual requires in_features == out_features"
    assert node_tile % 128 == 0

    f32 = jnp.float32
    C_pad = _round_up(C, 8)
    N_pad = _round_up(N, node_tile)
    grid_n = N_pad // node_tile

    # ---- graph preprocessing: build the dense normalized adjacency ONCE ----
    # (scatter/gather stays in plain JAX/XLA outside the kernel; the kernel is
    #  pure matmul + tanh + residual)
    loops = jnp.arange(N, dtype=jnp.int32)
    ei = jnp.concatenate(
        [edge_index.astype(jnp.int32), jnp.stack([loops, loops])], axis=1)
    row, col = ei[0], ei[1]

    deg = jnp.zeros((N,), f32).at[col].add(1.0)                  # in-degree (targets)
    dis = jnp.where(deg > 0, jax.lax.rsqrt(deg), 0.0)            # deg^-1/2 (0 for isolated)
    norm = dis[row] * dis[col]                                   # [E+N]

    # A_hat_T[j, i] = sum_e 1[row_e == j] * norm_e * 1[col_e == i]
    a_hat_t = jnp.zeros((N_pad, N_pad), f32).at[row, col].add(norm)

    # ---- pad features / nodes to TPU-friendly (sublane, lane) multiples ----
    x_p = jnp.pad(x, ((0, C_pad - C), (0, N_pad - N)))
    w_p = jnp.pad(w, ((0, C_pad - C), (0, C_pad - C)))

    # ---- cost estimate (each array counted once; x/W are not re-read per step)
    flops = (2 * C_pad * N_pad * N_pad        # propagation  x @ A_hat_T
             + 2 * C_pad * C_pad * N_pad)     # node-wise linear W @ prop
    transcendentals = C_pad * N_pad           # tanh
    bytes_accessed = 4 * (C_pad * N_pad       # x (read once)
                          + C_pad * C_pad     # W
                          + N_pad * N_pad     # A_hat_T (streamed tile by tile)
                          + C_pad * N_pad)    # output

    out_p = pl.pallas_call(
        graph_resnet_kernel,
        out_shape=jax.ShapeDtypeStruct((C_pad, N_pad), x.dtype),
        grid_spec=pltpu.PrefetchScalarGridSpec(
            num_scalar_prefetch=0,
            grid=(grid_n,),
            in_specs=[
                pl.BlockSpec((C_pad, N_pad), lambda i: (0, 0)),       # x (invariant)
                pl.BlockSpec((C_pad, C_pad), lambda i: (0, 0)),       # W (invariant)
                pl.BlockSpec((N_pad, node_tile), lambda i: (0, i)),   # A_hat_T tile
            ],
            out_specs=pl.BlockSpec((C_pad, node_tile), lambda i: (0, i)),
        ),
        compiler_params=pltpu.CompilerParams(
            dimension_semantics=("parallel",),     # shardable over v7x's 2 TCs
            vmem_limit_bytes=32 * 1024 * 1024,     # headroom for v7x's 64 MiB
        ),
        cost_estimate=pl.CostEstimate(
            flops=int(flops),
            transcendentals=int(transcendentals),
            bytes_accessed=int(bytes_accessed),
        ),
    )(x_p, w_p, a_hat_t)

    return out_p[:C, :N]


def graph_resnet_reference(x, w, edge_index):
    """Pure-JAX reference (mirrors the PyTorch module's math)."""
    C, N = x.shape
    loops = jnp.arange(N, dtype=jnp.int32)
    ei = jnp.concatenate(
        [edge_index.astype(jnp.int32), jnp.stack([loops, loops])], axis=1)
    row, col = ei[0], ei[1]
    x_lin = w @ x                                        # [C, N]
    deg = jnp.zeros((N,), x.dtype).at[col].add(1.0)
    dis = jnp.where(deg > 0, jax.lax.rsqrt(deg), 0.0)
    norm = dis[row] * dis[col]                           # [E']
    msgs = norm[None, :] * x_lin[:, row]                 # [C, E']
    gcn = jnp.zeros((C, N), x.dtype).at[:, col].add(msgs)
    return jnp.tanh(gcn) + x


if __name__ == "__main__":
    key = jax.random.PRNGKey(0)
    kx, kw, ke = jax.random.split(key, 3)

    C, N, E = 32, 512, 1024         # features, nodes, directed edges
    x = jax.random.normal(kx, (C, N), jnp.float32)
    bound = 1.0 / (C ** 0.5)        # torch.nn.Linear default init (bias=False)
    w = jax.random.uniform(kw, (C, C), jnp.float32, minval=-bound, maxval=bound)
    edge_index = jax.random.randint(ke, (2, E), 0, N, dtype=jnp.int32)

    out = graph_resnet_block(x, w, edge_index, node_tile=256)
    out = jax.block_until_ready(out)

    ref = graph_resnet_reference(x, w, edge_index)
    assert out.shape == (C, N)
    assert jnp.allclose(out, ref, atol=1e-4, rtol=1e-4), (
        "mismatch vs reference, max abs err = "
        f"{float(jnp.max(jnp.abs(out - ref)))}")

    print("KERNEL_OK")
</pallas_src>

<mosaic_0001>
module attributes {stable_mosaic.version = 11 : i64} {
  func.func @graph_resnet_kernel(%arg0: i32, %arg1: memref<32x512xf32, #tpu.memory_space<vmem>>, %arg2: memref<32x32xf32, #tpu.memory_space<vmem>>, %arg3: memref<512x256xf32, #tpu.memory_space<vmem>>, %arg4: memref<32x256xf32, #tpu.memory_space<vmem>>) attributes {dimension_semantics = [#tpu.dimension_semantics<parallel>], iteration_bounds = array<i64: 2>, scalar_prefetch = 0 : i64, scratch_operands = 0 : i64, tpu.core_type = #tpu.core_type<tc>, window_params = [{pipeline_mode = #tpu.pipeline_mode<synchronous>, transform_indices = @transform_0, window_bounds = array<i64: 32, 512>}, {pipeline_mode = #tpu.pipeline_mode<synchronous>, transform_indices = @transform_1, window_bounds = array<i64: 32, 32>}, {transform_indices = @transform_2, window_bounds = array<i64: 512, 256>}, {transform_indices = @transform_3, window_bounds = array<i64: 32, 256>}]} {
    %c256_i32 = arith.constant 256 : i32
    %0 = arith.muli %arg0, %c256_i32 : i32
    %1 = tpu.assume_multiple %0, 128 : i32
    %c0 = arith.constant 0 : index
    %c0_0 = arith.constant 0 : index
    %2 = vector.load %arg1[%c0, %c0_0] : memref<32x512xf32, #tpu.memory_space<vmem>>, vector<32x512xf32>
    %c0_1 = arith.constant 0 : index
    %c0_2 = arith.constant 0 : index
    %3 = vector.load %arg3[%c0_1, %c0_2] : memref<512x256xf32, #tpu.memory_space<vmem>>, vector<512x256xf32>
    %cst = arith.constant dense<0.000000e+00> : vector<32x256xf32>
    %4 = tpu.matmul %2, %3, %cst {dimension_numbers = #tpu.dot_dimension_numbers<[1], [0], [0], [1], [0, 0, 1, 1], [], []>} : vector<32x512xf32>, vector<512x256xf32>, vector<32x256xf32> -> vector<32x256xf32>
    %c0_3 = arith.constant 0 : index
    %c0_4 = arith.constant 0 : index
    %5 = vector.load %arg2[%c0_3, %c0_4] : memref<32x32xf32, #tpu.memory_space<vmem>>, vector<32x32xf32>
    %cst_5 = arith.constant dense<0.000000e+00> : vector<32x256xf32>
    %6 = tpu.matmul %5, %4, %cst_5 {dimension_numbers = #tpu.dot_dimension_numbers<[1], [0], [0], [1], [0, 0, 1, 1], [], []>} : vector<32x32xf32>, vector<32x256xf32>, vector<32x256xf32> -> vector<32x256xf32>
    %c0_6 = arith.constant 0 : index
    %7 = arith.index_cast %1 : i32 to index
    %8 = vector.load %arg1[%c0_6, %7] : memref<32x512xf32, #tpu.memory_space<vmem>>, vector<32x256xf32>
    %9 = math.tanh %6 : vector<32x256xf32>
    %10 = arith.addf %9, %8 : vector<32x256xf32>
    %c0_7 = arith.constant 0 : index
    %c0_8 = arith.constant 0 : index
    %11 = vector.load %arg4[%c0_7, %c0_8] : memref<32x256xf32, #tpu.memory_space<vmem>>, vector<32x256xf32>
    tpu.vector_store %arg4[%c0_7, %c0_8], %10 {strides = array<i32>} : memref<32x256xf32, #tpu.memory_space<vmem>>, vector<32x256xf32>,
    return
  }
  func.func @transform_0(%arg0: i32) -> (i32, i32) {
    %c0_i32 = arith.constant 0 : i32
    %c0_i32_0 = arith.constant 0 : i32
    %c0_i32_1 = arith.constant 0 : i32
    return %c0_i32, %c0_i32_0 : i32, i32
  }
  func.func @transform_1(%arg0: i32) -> (i32, i32) {
    %c0_i32 = arith.constant 0 : i32
    %c0_i32_0 = arith.constant 0 : i32
    %c0_i32_1 = arith.constant 0 : i32
    return %c0_i32, %c0_i32_0 : i32, i32
  }
  func.func @transform_2(%arg0: i32) -> (i32, i32) {
    %c0_i32 = arith.constant 0 : i32
    %c0_i32_0 = arith.constant 0 : i32
    return %c0_i32, %arg0 : i32, i32
  }
  func.func @transform_3(%arg0: i32) -> (i32, i32) {
    %c0_i32 = arith.constant 0 : i32
    %c0_i32_0 = arith.constant 0 : i32
    return %c0_i32, %arg0 : i32, i32
  }
}

</mosaic_0001>

<bundles_post_ra>
// kernel: tpu_custom_call.1
= control target key start
LH: loop header
LB: loop body
LE: loop exit
PB: predicated region body
PF: predicated region fallthrough
CT: control target
= control target key end

     0   :  { %s1443_s0 = inlined_call_operand.hbm [shape: f32[32,512], index: 0, kind: input, shape index: {}]   ;;  %s1444_s1 = inlined_call_operand.hbm [shape: f32[32,32], index: 1, kind: input, shape index: {}]   ;;  %s1445_s2 = inlined_call_operand.hbm [shape: f32[512,512], index: 2, kind: input, shape index: {}]   ;;  %s1446_s3 = inlined_call_operand.hbm [shape: f32[32,512], index: 3, kind: output, shape index: {}]  }
   0x1   :  { %1452 = sst [smem:[#allocation13_spill]] %s1443_s0 }
   0x2   :  { %8 = vsyncpa [#allocation3], 0 }
   0x3   :  { %9 = vsyncpa [#allocation6], 0 }
   0x4   :  { %10 = vsyncpa [#allocation4], 0 }
   0x5   :  { %12 = vsyncpa [#allocation4 + $0x1], 0  ;;  %s1106_s12 = smov 0   ;;  %s1108_s13 = smov 0  }
   0x6   :  { %s1110_s14 = smov 0   ;;  %s1112_s15 = smov 0  }
   0x7 LB: > { %s1127_s16 = sadd.s32 4294967295, %s1070_s15   ;;  %s791_s17 = sadd.s32 4294967294, %s1070_s15   ;;  %s1070_s15 = sphi %s1112_s15, %s1474_s15   ;;  %s1066_s14 = sphi %s1110_s14, %s1473_s14   ;;  %s1062_s13 = sphi %s1108_s13, %s1472_s13   ;;  %s1058_s12 = sphi %s1106_s12, %s1471_s12  }
   0x8   : > { %s1131_s18 = sadd.s32 1, %s1070_s15   ;;  %s67_s19 = sadd.s32 1, %s1066_s14 }
   0x9   : > { %s64_s20 = ssub.s32 %s1070_s15, %s1131_s18  ;;  %p74_p0 = scmp.ne.s32.totalorder %s1066_s14, %s1062_s13 }
   0xa   : > { %p65_p1 = scmp.eq.s32.totalorder %s64_s20, 0  ;;  %p75_p2 = scmp.eq.s32.totalorder %s1070_s15, 0 }
   0xb   : > { %p80_p3 = scmp.ne.s32.totalorder %s1062_s13, %s1058_s12  ;;  %p1448_p4 = scmp.eq.s32.totalorder %s1127_s16, 0 }
   0xc   : > { %s1143_s21 = scalar_select %p65_p1, %s1066_s14, %s67_s19  }
   0xd   : > { %p1145_p5 = por %p75_p2, %p74_p0  ;;  %p1151_p6 = por %p1448_p4, %p80_p3 }
   0xe   : > { %p104_p7 = scmp.eq.s32.totalorder %s1127_s16, 1  ;;  %p110_p8 = scmp.eq.s32.totalorder %s791_s17, 1 }
   0xf   : > { %s1454_s23 = scalar_select %p1151_p6, 1, 0 }
  0x10   : > { %p792_p9 = scmp.ge.s32.totalorder %s1070_s15, 1  ;;  %p117_p10 = scmp.lt.s32.totalorder %s1070_s15, 3 }
  0x11   : > { %p1158_p11 = por %p104_p7, %p74_p0  ;;  %p1162_p12 = por %p110_p8, %p80_p3 }
  0x12   : > { %p1166_p13 = pnand %p792_p9, %p117_p10  ;;  %s1072_s27 = smov [#allocation2]  }
  0x13   : > { %s1455_s24 = scalar_select %p1158_p11, 1, 0 }
  0x14   : > { %s1456_s25 = scalar_select %p1162_p12, 1, 0 }
  0x15   : > { %s1457_s26 = scalar_select %p1166_p13, 1, 0 }
  0x16   : > { %p837_p1 = pneg %p1166_p13  ;;  %s129_s28 = sshll.u32 %s1072_s27, 4  ;;  %s130_s28 = int_to_ptr.vmem [resolvable:$true] %s129_s28 }
  0x17   : > { %p854_p3 = scmp.lt.s32.totalorder %s1070_s15, 2  ;;  %s1073_s30 = smov [#allocation5]  }
  0x18   : > { %p1174_p2 = pnand %p837_p1, %p1448_p4  ;;  %s142_s4 = sshll.u32 %s1073_s30, 4  ;;  %s143_s4 = int_to_ptr.vmem [resolvable:$true] %s142_s4 }
  0x19   : > { %s929_s5 = scalar_lea.vmem %s130_s28, 2048  ;;  %p937_p12 = scmp.lt.s32.totalorder %s130_s28, %s130_s28 }
  0x1a   : > { %p920_p7 = pneg %p1174_p2  ;;  %p930_p8 = scmp.ne.s32.totalorder %s130_s28, %s929_s5 }
  0x1b   : > { %p938_p11 = scmp.lt.s32.totalorder %s929_s5, %s929_s5 }
  0x1c   : > { %p932_p9 = pnand %p930_p8, %p920_p7 }
  0x1d   : > { %p939_p1 = por %p938_p11, %p937_p12 }
  0x1e   : > { %p933_p10 = pneg %p932_p9 }
  0x20   : > { %p940_p4 = pnand %p939_p1, %p933_p10 }
  0x22   : > { %943 = shalt.err (!%p940_p4)
}
  0x23   : > { %s1449_s6 = smov 512   ;;  %s1075_s7 = smov 32  }
  0x24   : > { %s1459_s0 = sld [smem:[#allocation13_spill]]  ;;  %p1196_p8 = pnand %p854_p3, %p1145_p5 }
  0x25   : > { %s156_s11 = sand.u32 1, %s1070_s15   ;;  %s955_s17 = scalar_lea.vmem %s143_s4, 512 }
  0x26   : > { %p956_p4 = scmp.ne.s32.totalorder %s143_s4, %s955_s17  ;;  %p963_p9 = scmp.lt.s32.totalorder %s143_s4, %s143_s4 }
  0x27   : > { %p964_p10 = scmp.lt.s32.totalorder %s955_s17, %s955_s17 }
  0x28   : > { %p958_p11 = pnand %p956_p4, %p920_p7 }
  0x29   : > { %p965_p1 = por %p964_p10, %p963_p9 }
  0x2a   : > { %840 = dma.hbm_to_vmem [thread:$0]  (!%p1174_p2), %s1459_s0, 2048, %s130_s28, [#allocation3], %s1449_s6, %s1449_s6, %s1075_s7  }
  0x2b   : > { %p959_p12 = pneg %p958_p11 }
  0x2d   : > { %p966_p0 = pnand %p965_p1, %p959_p12 }
  0x2f   : > { %969 = shalt.err (!%p966_p0)
}
  0x30   : > { %s1076_s19 = smov 128   ;;  %s1077_s20 = smov 8  }
  0x31   : > { %843 = dma.hbm_to_vmem [thread:$0]  (!%p1174_p2), %s1444_s1, 512, %s143_s4, [#allocation6], %s1076_s19, %s1076_s19, %s1077_s20  }
  0x32   : > { %s158_s28 = sand.u32 1, %s1066_s14   ;;  %s815_s5 = sshll.u32 %s1070_s15, 8 }
  0x33   : > { %s796_s30 = sshll.u32 %s158_s28, 10  ;;  %s1214_s9 = scalar_lea.hbm %s1445_s2, %s815_s5 }
  0x34   : > { %s160_s17 = scalar_lea.vmem [#allocation7], %s796_s30  ;;  %s1218_s29 = scalar_lea.sflag [#allocation3], %s156_s11 }
  0x35   : > { %s167_s6 = sshll.u32 %s160_s17, 4  ;;  %s970_s0 = scalar_lea.hbm %s1214_s9, 16384  ;;  %s1216_s6 = int_to_ptr.vmem [resolvable:$true] %s167_s6 }
  0x36   : > { %p971_p5 = scmp.ne.s32.totalorder %s1214_s9, %s970_s0  ;;  %p972_p2 = pneg %p1196_p8 }
  0x37   : > { %s975_s20 = scalar_lea.hbm %s1445_s2, 32768  ;;  %p976_p7 = scmp.lt.s32.totalorder %s1214_s9, %s1445_s2 }
  0x38   : > { %p973_p0 = pnand %p972_p2, %p971_p5  ;;  %p977_p4 = scmp.lt.s32.totalorder %s975_s20, %s970_s0 }
  0x3a   : > { %p974_p3 = pneg %p973_p0  ;;  %p978_p11 = por %p977_p4, %p976_p7 }
  0x3c   : > { %p979_p12 = pnand %p978_p11, %p974_p3 }
  0x3e   : > { %982 = shalt.err (!%p979_p12)
}
  0x3f   : > { %s983_s11 = scalar_lea.vmem %s1216_s6, 16384  ;;  %s1078_s28 = smov [#allocation7]  }
  0x40   : > { %p984_p9 = scmp.ne.s32.totalorder %s1216_s6, %s983_s11  ;;  %s988_s30 = sshll.u32 %s1078_s28, 4  ;;  %s989_s30 = int_to_ptr.vmem [resolvable:$false] %s988_s30 }
  0x41   : > { %s990_s5 = scalar_lea.vmem %s989_s30, 32768  ;;  %p991_p5 = scmp.lt.s32.totalorder %s1216_s6, %s989_s30 }
  0x42   : > { %p986_p10 = pnand %p984_p9, %p972_p2  ;;  %p992_p0 = scmp.lt.s32.totalorder %s990_s5, %s983_s11 }
  0x44   : > { %p987_p1 = pneg %p986_p10  ;;  %p993_p6 = por %p992_p0, %p991_p5 }
  0x46   : > { %p994_p13 = pnand %p993_p6, %p987_p1 }
  0x48   : > { %997 = shalt.err (!%p994_p13)
}
  0x49   : > { %s1079_s0 = smov 256   ;;  %s1080_s7 = smov 16  }
  0x4a   : > { %s1461_s8 = smov 512   ;;  %p1462_p2 = scmp.ne.s32.totalorder %s1457_s26, 0 }
  0x4b   : > { %847 = dma.hbm_to_vmem [thread:$0]  (!%p1196_p8), %s1214_s9, 16384, %s1216_s6, %s1218_s29, %s1461_s8, %s1079_s0, %s1080_s7  }
  0x4c   : > { %179 = sbr.rel (%p1462_p2) target bundleno = 605 (0x25d), region = 32  ;;  %p1463_p3 = scmp.eq.s32.totalorder (!%p1462_p2), %s1127_s16, 0 }
  0x51   : > { %1041 = dma.done.wait (%p1463_p3), [#allocation3], 2048   ;;  %p1464_p7 = pmov %p1463_p3 }
  0x52   : > { %p1465_p6 = pmov %p1463_p3 }
  0x53   : > { %1043 = vsyncadd (%p1464_p7), [#allocation3], 4294965248 }
  0x54   : > { %1045 = dma.done.wait (%p1465_p6), [#allocation6], 512   ;;  %p1466_p13 = pmov %p1463_p3 }
  0x55   : > { %s189_s10 = sand.u32 1, %s1127_s16   ;;  %s1252_s6 = sand.u32 1, %s1062_s13  }
  0x56   : > { %1047 = vsyncadd (%p1466_p13), [#allocation6], 4294966784  ;;  %s802_s26 = sshll.u32 %s1252_s6, 10  ;;  %s190_s9 = scalar_lea.sflag [#allocation3], %s189_s10 }
  0x57   : > { %s1255_s17 = scalar_lea.vmem [#allocation7], %s802_s26  ;;  %p1467_p8 = scmp.ne.s32.totalorder %s1454_s23, 0 }
  0x59   : > { %1049 = dma.done.wait (%p1467_p8), %s190_s9, 16384  }
  0x5a   : > { %1051 = vsyncadd (%p1467_p8), %s190_s9, 4294950912  ;;  %v266_v0 = vld [vmem:[%s1255_s17 + $0xf8] sm:$0xff]  ;;  %v265_v2 = vld [vmem:[%s1255_s17 + $0xf0] sm:$0xff]  ;;  %vm545_vm0 = vcmask 261120   ;;  %s804_s23 = sshll.u32 %s1127_s16, 8  ;;  %s803_s19 = sshll.u32 %s1252_s6, 6 }
  0x5b   : > { %v330_v1 = vld [vmem:[%s1255_s17 + $0x2f8] sm:$0xff]  ;;  %363 = vmatprep.subr.mxu0 %v266_v0  ;;  %v329_v3 = vld [vmem:[%s1255_s17 + $0x2f0] sm:$0xff]  ;;  %v264_v4 = vld [vmem:[%s1255_s17 + $0xe8] sm:$0xff]  ;;  %s647_s29 = sshra.s32 %s804_s23, 7  ;;  %s215_s22 = scalar_lea.vmem [#allocation8], %s803_s19 }
  0x5c   : > { %452 = vmatprep.subr.mxu1 %v330_v1  ;;  %v328_v5 = vld [vmem:[%s1255_s17 + $0x2e8] sm:$0xff]  ;;  %364 = vmatpush1.msra.mxu0 %v265_v2  ;;  %v263_v6 = vld [vmem:[%s1255_s17 + $0xe0] sm:$0xff]  ;;  %v262_v8 = vld [vmem:[%s1255_s17 + $0xd8] sm:$0xff]  ;;  %s809_s4 = sshll.u32 %s647_s29, 3  ;;  %s697_s27 = sshll.u32 %s215_s22, 4  ;;  %s1400_s27 = int_to_ptr.vmem [resolvable:$true] %s697_s27 }
  0x5d   : > { %453 = vmatpush1.msra.mxu1 %v329_v3  ;;  %v327_v7 = vld [vmem:[%s1255_s17 + $0x2e0] sm:$0xff]  ;;  %365 = vmatprep.subr.mxu0 %v264_v4  ;;  %v326_v9 = vld [vmem:[%s1255_s17 + $0x2d8] sm:$0xff]  ;;  %v261_v10 = vld [vmem:[%s1255_s17 + $0xd0] sm:$0xff]  ;;  %s650_s20 = scalar_lea.vmem [#allocation2], %s809_s4  ;;  %s1398_s30 = scalar_lea.hbm %s1446_s3, %s804_s23 }
  0x5e   : > { %454 = vmatprep.subr.mxu1 %v328_v5  ;;  %v325_v11 = vld [vmem:[%s1255_s17 + $0x2d0] sm:$0xff]  ;;  %366 = vmatpush1.msra.mxu0 %v263_v6  ;;  %v260_v12 = vld [vmem:[%s1255_s17 + $0xc8] sm:$0xff]  ;;  %v259_v14 = vld [vmem:[%s1255_s17 + $0xc0] sm:$0xff]  ;;  %s684_s16 = scalar_lea.sflag [#allocation4], %s1252_s6  ;;  %s998_s5 = scalar_lea.vmem %s1400_s27, 1024 }
  0x5f   : > { %455 = vmatpush1.msra.mxu1 %v327_v7  ;;  %v324_v13 = vld [vmem:[%s1255_s17 + $0x2c8] sm:$0xff]  ;;  %367 = vmatprep.subr.mxu0 %v262_v8  ;;  %v323_v15 = vld [vmem:[%s1255_s17 + $0x2c0] sm:$0xff]  ;;  %v258_v16 = vld [vmem:[%s1255_s17 + $0xb8] sm:$0xff]  ;;  %p999_p4 = scmp.ne.s32.totalorder %s1400_s27, %s998_s5  ;;  %p1468_p11 = scmp.ne.s32.totalorder %s1455_s24, 0 }
  0x60   : > { %456 = vmatprep.subr.mxu1 %v326_v9  ;;  %368 = vmatpush1.msra.mxu0 %v261_v10  ;;  %v322_v17 = vld [vmem:[%s1255_s17 + $0x2b8] sm:$0xff]  ;;  %v257_v18 = vld [vmem:[%s1255_s17 + $0xb0] sm:$0xff]  ;;  %v256_v20 = vld [vmem:[%s1255_s17 + $0xa8] sm:$0xff]  ;;  %s1082_s0 = smov [#allocation8]  }
  0x61   : > { %457 = vmatpush1.msra.mxu1 %v325_v11  ;;  %369 = vmatprep.subr.mxu0 %v260_v12  ;;  %v321_v19 = vld [vmem:[%s1255_s17 + $0x2b0] sm:$0xff]  ;;  %v320_v21 = vld [vmem:[%s1255_s17 + $0x2a8] sm:$0xff]  ;;  %v255_v22 = vld [vmem:[%s1255_s17 + $0xa0] sm:$0xff]  ;;  %p1000_p12 = pnand %p999_p4, %p1468_p11  ;;  %s1002_s7 = sshll.u32 %s1082_s0, 4  ;;  %s1003_s7 = int_to_ptr.vmem [resolvable:$false] %s1002_s7 }
  0x62   : > { %458 = vmatprep.subr.mxu1 %v324_v13  ;;  %370 = vmatpush1.msra.mxu0 %v259_v14  ;;  %v319_v23 = vld [vmem:[%s1255_s17 + $0x2a0] sm:$0xff]  ;;  %v254_v24 = vld [vmem:[%s1255_s17 + $0x98] sm:$0xff]  ;;  %v253_v26 = vld [vmem:[%s1255_s17 + $0x90] sm:$0xff]  ;;  %s1004_s8 = scalar_lea.vmem %s1003_s7, 2048  ;;  %p1005_p10 = scmp.lt.s32.totalorder %s1400_s27, %s1003_s7 }
  0x63   : > { %459 = vmatpush1.msra.mxu1 %v323_v15  ;;  %371 = vmatprep.subr.mxu0 %v258_v16  ;;  %v318_v25 = vld [vmem:[%s1255_s17 + $0x298] sm:$0xff]  ;;  %v317_v27 = vld [vmem:[%s1255_s17 + $0x290] sm:$0xff]  ;;  %v252_v28 = vld [vmem:[%s1255_s17 + $0x88] sm:$0xff]  ;;  %p1001_p9 = pneg %p1000_p12  ;;  %p1006_p1 = scmp.lt.s32.totalorder %s1004_s8, %s998_s5 }
  0x64   : > { %460 = vmatprep.subr.mxu1 %v322_v17  ;;  %372 = vmatpush1.msra.mxu0 %v257_v18  ;;  %v316_v29 = vld [vmem:[%s1255_s17 + $0x288] sm:$0xff]  ;;  %v251_v30 = vld [vmem:[%s1255_s17 + $0x80] sm:$0xff]  ;;  %v250_v32 = vld [vmem:[%s1255_s17 + $0x78] sm:$0xff] }
  0x65   : > { %461 = vmatpush1.msra.mxu1 %v321_v19  ;;  %373 = vmatprep.subr.mxu0 %v256_v20  ;;  %v315_v31 = vld [vmem:[%s1255_s17 + $0x280] sm:$0xff]  ;;  %v314_v33 = vld [vmem:[%s1255_s17 + $0x278] sm:$0xff]  ;;  %v249_v34 = vld [vmem:[%s1255_s17 + $0x70] sm:$0xff]  ;;  %p1007_p5 = por %p1006_p1, %p1005_p10 }
  0x66   : > { %462 = vmatprep.subr.mxu1 %v320_v21  ;;  %374 = vmatpush1.msra.mxu0 %v255_v22  ;;  %v313_v35 = vld [vmem:[%s1255_s17 + $0x270] sm:$0xff]  ;;  %v248_v36 = vld [vmem:[%s1255_s17 + $0x68] sm:$0xff]  ;;  %v247_v38 = vld [vmem:[%s1255_s17 + $0x60] sm:$0xff] }
  0x67   : > { %463 = vmatpush1.msra.mxu1 %v319_v23  ;;  %375 = vmatprep.subr.mxu0 %v254_v24  ;;  %v312_v37 = vld [vmem:[%s1255_s17 + $0x268] sm:$0xff]  ;;  %v311_v39 = vld [vmem:[%s1255_s17 + $0x260] sm:$0xff]  ;;  %v246_v40 = vld [vmem:[%s1255_s17 + $0x58] sm:$0xff]  ;;  %p1008_p0 = pnand %p1007_p5, %p1001_p9 }
  0x68   : > { %464 = vmatprep.subr.mxu1 %v318_v25  ;;  %376 = vmatpush1.msra.mxu0 %v253_v26  ;;  %v310_v41 = vld [vmem:[%s1255_s17 + $0x258] sm:$0xff]  ;;  %v245_v42 = vld [vmem:[%s1255_s17 + $0x50] sm:$0xff]  ;;  %v244_v44 = vld [vmem:[%s1255_s17 + $0x48] sm:$0xff] }
  0x69   : > { %465 = vmatpush1.msra.mxu1 %v317_v27  ;;  %377 = vmatprep.subr.mxu0 %v252_v28  ;;  %v309_v43 = vld [vmem:[%s1255_s17 + $0x250] sm:$0xff]  ;;  %v308_v45 = vld [vmem:[%s1255_s17 + $0x248] sm:$0xff]  ;;  %v243_v46 = vld [vmem:[%s1255_s17 + $0x40] sm:$0xff] }
  0x6a   : > { %466 = vmatprep.subr.mxu1 %v316_v29  ;;  %378 = vmatpush1.msra.mxu0 %v251_v30  ;;  %v307_v47 = vld [vmem:[%s1255_s17 + $0x240] sm:$0xff]  ;;  %v242_v48 = vld [vmem:[%s1255_s17 + $0x38] sm:$0xff]  ;;  %v241_v50 = vld [vmem:[%s1255_s17 + $0x30] sm:$0xff] }
  0x6b   : > { %467 = vmatpush1.msra.mxu1 %v315_v31  ;;  %379 = vmatprep.subr.mxu0 %v250_v32  ;;  %v306_v49 = vld [vmem:[%s1255_s17 + $0x238] sm:$0xff]  ;;  %v305_v51 = vld [vmem:[%s1255_s17 + $0x230] sm:$0xff]  ;;  %v240_v52 = vld [vmem:[%s1255_s17 + $0x28] sm:$0xff] }
  0x6c   : > { %468 = vmatprep.subr.mxu1 %v314_v33  ;;  %380 = vmatpush1.msra.mxu0 %v249_v34  ;;  %v304_v53 = vld [vmem:[%s1255_s17 + $0x228] sm:$0xff]  ;;  %v239_v54 = vld [vmem:[%s1255_s17 + $0x20] sm:$0xff]  ;;  %v238_v56 = vld [vmem:[%s1255_s17 + $0x18] sm:$0xff] }
  0x6d   : > { %469 = vmatpush1.msra.mxu1 %v313_v35  ;;  %381 = vmatprep.subr.mxu0 %v248_v36  ;;  %v303_v55 = vld [vmem:[%s1255_s17 + $0x220] sm:$0xff]  ;;  %v302_v57 = vld [vmem:[%s1255_s17 + $0x218] sm:$0xff]  ;;  %v237_v58 = vld [vmem:[%s1255_s17 + $0x10] sm:$0xff] }
  0x6e   : > { %470 = vmatprep.subr.mxu1 %v312_v37  ;;  %382 = vmatpush1.msra.mxu0 %v247_v38  ;;  %v301_v59 = vld [vmem:[%s1255_s17 + $0x210] sm:$0xff]  ;;  %v236_v60 = vld [vmem:[%s1255_s17 + $0x8] sm:$0xff]  ;;  %v235_v62 = vld [vmem:[%s1255_s17] sm:$0xff] }
  0x6f   : > { %471 = vmatpush1.msra.mxu1 %v311_v39  ;;  %383 = vmatprep.subr.mxu0 %v246_v40  ;;  %v300_v61 = vld [vmem:[%s1255_s17 + $0x208] sm:$0xff]  ;;  %v299_v63 = vld [vmem:[%s1255_s17 + $0x200] sm:$0xff]  ;;  %v298_v0 = vld [vmem:[%s1255_s17 + $0x1f8] sm:$0xff] }
  0x70   : > { %472 = vmatprep.subr.mxu1 %v310_v41  ;;  %384 = vmatpush1.msra.mxu0 %v245_v42  ;;  %v362_v1 = vld [vmem:[%s1255_s17 + $0x3f8] sm:$0xff]  ;;  %v297_v2 = vld [vmem:[%s1255_s17 + $0x1f0] sm:$0xff]  ;;  %v296_v4 = vld [vmem:[%s1255_s17 + $0x1e8] sm:$0xff] }
  0x71   : > { %473 = vmatpush1.msra.mxu1 %v309_v43  ;;  %385 = vmatprep.subr.mxu0 %v244_v44  ;;  %v361_v3 = vld [vmem:[%s1255_s17 + $0x3f0] sm:$0xff]  ;;  %v360_v5 = vld [vmem:[%s1255_s17 + $0x3e8] sm:$0xff]  ;;  %v295_v6 = vld [vmem:[%s1255_s17 + $0x1e0] sm:$0xff] }
  0x72   : > { %474 = vmatprep.subr.mxu1 %v308_v45  ;;  %386 = vmatpush1.msra.mxu0 %v243_v46  ;;  %v359_v7 = vld [vmem:[%s1255_s17 + $0x3e0] sm:$0xff]  ;;  %v294_v8 = vld [vmem:[%s1255_s17 + $0x1d8] sm:$0xff]  ;;  %v293_v10 = vld [vmem:[%s1255_s17 + $0x1d0] sm:$0xff] }
  0x73   : > { %475 = vmatpush1.msra.mxu1 %v307_v47  ;;  %387 = vmatprep.subr.mxu0 %v242_v48  ;;  %v358_v9 = vld [vmem:[%s1255_s17 + $0x3d8] sm:$0xff]  ;;  %v357_v11 = vld [vmem:[%s1255_s17 + $0x3d0] sm:$0xff]  ;;  %v292_v12 = vld [vmem:[%s1255_s17 + $0x1c8] sm:$0xff] }
  0x74   : > { %476 = vmatprep.subr.mxu1 %v306_v49  ;;  %388 = vmatpush1.msra.mxu0 %v241_v50  ;;  %v356_v13 = vld [vmem:[%s1255_s17 + $0x3c8] sm:$0xff]  ;;  %v291_v14 = vld [vmem:[%s1255_s17 + $0x1c0] sm:$0xff]  ;;  %v290_v16 = vld [vmem:[%s1255_s17 + $0x1b8] sm:$0xff] }
  0x75   : > { %477 = vmatpush1.msra.mxu1 %v305_v51  ;;  %389 = vmatprep.subr.mxu0 %v240_v52  ;;  %v355_v15 = vld [vmem:[%s1255_s17 + $0x3c0] sm:$0xff]  ;;  %v354_v17 = vld [vmem:[%s1255_s17 + $0x3b8] sm:$0xff]  ;;  %v289_v18 = vld [vmem:[%s1255_s17 + $0x1b0] sm:$0xff] }
  0x76   : > { %478 = vmatprep.subr.mxu1 %v304_v53  ;;  %390 = vmatpush1.msra.mxu0 %v239_v54  ;;  %v353_v19 = vld [vmem:[%s1255_s17 + $0x3b0] sm:$0xff]  ;;  %v288_v20 = vld [vmem:[%s1255_s17 + $0x1a8] sm:$0xff]  ;;  %v287_v22 = vld [vmem:[%s1255_s17 + $0x1a0] sm:$0xff] }
  0x77   : > { %479 = vmatpush1.msra.mxu1 %v303_v55  ;;  %391 = vmatprep.subr.mxu0 %v238_v56  ;;  %v352_v21 = vld [vmem:[%s1255_s17 + $0x3a8] sm:$0xff]  ;;  %v351_v23 = vld [vmem:[%s1255_s17 + $0x3a0] sm:$0xff]  ;;  %v286_v24 = vld [vmem:[%s1255_s17 + $0x198] sm:$0xff] }
  0x78   : > { %480 = vmatprep.subr.mxu1 %v302_v57  ;;  %392 = vmatpush1.msra.mxu0 %v237_v58  ;;  %v350_v25 = vld [vmem:[%s1255_s17 + $0x398] sm:$0xff]  ;;  %v285_v26 = vld [vmem:[%s1255_s17 + $0x190] sm:$0xff]  ;;  %v284_v28 = vld [vmem:[%s1255_s17 + $0x188] sm:$0xff] }
  0x79   : > { %481 = vmatpush1.msra.mxu1 %v301_v59  ;;  %393 = vmatprep.subr.mxu0 %v236_v60  ;;  %v349_v27 = vld [vmem:[%s1255_s17 + $0x390] sm:$0xff]  ;;  %v348_v29 = vld [vmem:[%s1255_s17 + $0x388] sm:$0xff]  ;;  %v283_v30 = vld [vmem:[%s1255_s17 + $0x180] sm:$0xff] }
  0x7a   : > { %482 = vmatprep.subr.mxu1 %v300_v61  ;;  %394 = vmatpush1.msra.mxu0 %v235_v62  ;;  %v347_v31 = vld [vmem:[%s1255_s17 + $0x380] sm:$0xff]  ;;  %v282_v32 = vld [vmem:[%s1255_s17 + $0x178] sm:$0xff]  ;;  %v281_v34 = vld [vmem:[%s1255_s17 + $0x170] sm:$0xff] }
  0x7b   : > { %483 = vmatpush1.msra.mxu1 %v299_v63  ;;  %395 = vmatprep.subr.mxu0 %v298_v0  ;;  %v346_v33 = vld [vmem:[%s1255_s17 + $0x378] sm:$0xff]  ;;  %v345_v35 = vld [vmem:[%s1255_s17 + $0x370] sm:$0xff]  ;;  %v280_v36 = vld [vmem:[%s1255_s17 + $0x168] sm:$0xff] }
  0x7c   : > { %484 = vmatprep.subr.mxu1 %v362_v1  ;;  %396 = vmatpush2.msra.mxu0 %v297_v2  ;;  %v344_v37 = vld [vmem:[%s1255_s17 + $0x368] sm:$0xff]  ;;  %v279_v38 = vld [vmem:[%s1255_s17 + $0x160] sm:$0xff]  ;;  %v278_v40 = vld [vmem:[%s1255_s17 + $0x158] sm:$0xff] }
  0x7d   : > { %485 = vmatpush2.msra.mxu1 %v361_v3  ;;  %397 = vmatprep.subr.mxu0 %v296_v4  ;;  %v343_v39 = vld [vmem:[%s1255_s17 + $0x360] sm:$0xff]  ;;  %v342_v41 = vld [vmem:[%s1255_s17 + $0x358] sm:$0xff]  ;;  %v277_v42 = vld [vmem:[%s1255_s17 + $0x150] sm:$0xff] }
  0x7e   : > { %486 = vmatprep.subr.mxu1 %v360_v5  ;;  %398 = vmatpush2.msra.mxu0 %v295_v6  ;;  %v341_v43 = vld [vmem:[%s1255_s17 + $0x350] sm:$0xff]  ;;  %v276_v44 = vld [vmem:[%s1255_s17 + $0x148] sm:$0xff]  ;;  %v275_v46 = vld [vmem:[%s1255_s17 + $0x140] sm:$0xff] }
  0x7f   : > { %487 = vmatpush2.msra.mxu1 %v359_v7  ;;  %399 = vmatprep.subr.mxu0 %v294_v8  ;;  %v340_v45 = vld [vmem:[%s1255_s17 + $0x348] sm:$0xff]  ;;  %v339_v47 = vld [vmem:[%s1255_s17 + $0x340] sm:$0xff]  ;;  %v274_v48 = vld [vmem:[%s1255_s17 + $0x138] sm:$0xff] }
  0x80   : > { %488 = vmatprep.subr.mxu1 %v358_v9  ;;  %400 = vmatpush2.msra.mxu0 %v293_v10  ;;  %v338_v49 = vld [vmem:[%s1255_s17 + $0x338] sm:$0xff]  ;;  %v273_v50 = vld [vmem:[%s1255_s17 + $0x130] sm:$0xff]  ;;  %v272_v52 = vld [vmem:[%s1255_s17 + $0x128] sm:$0xff] }
  0x81   : > { %489 = vmatpush2.msra.mxu1 %v357_v11  ;;  %401 = vmatprep.subr.mxu0 %v292_v12  ;;  %v337_v51 = vld [vmem:[%s1255_s17 + $0x330] sm:$0xff]  ;;  %v336_v53 = vld [vmem:[%s1255_s17 + $0x328] sm:$0xff]  ;;  %v271_v54 = vld [vmem:[%s1255_s17 + $0x120] sm:$0xff] }
  0x82   : > { %490 = vmatprep.subr.mxu1 %v356_v13  ;;  %402 = vmatpush2.msra.mxu0 %v291_v14  ;;  %v335_v55 = vld [vmem:[%s1255_s17 + $0x320] sm:$0xff]  ;;  %v270_v56 = vld [vmem:[%s1255_s17 + $0x118] sm:$0xff]  ;;  %v269_v58 = vld [vmem:[%s1255_s17 + $0x110] sm:$0xff] }
  0x83   : > { %491 = vmatpush2.msra.mxu1 %v355_v15  ;;  %403 = vmatprep.subr.mxu0 %v290_v16  ;;  %v334_v57 = vld [vmem:[%s1255_s17 + $0x318] sm:$0xff]  ;;  %v333_v59 = vld [vmem:[%s1255_s17 + $0x310] sm:$0xff]  ;;  %v268_v60 = vld [vmem:[%s1255_s17 + $0x108] sm:$0xff]  ;;  %v1081_v16 = vmov 0.0  }
  0x84   : > { %492 = vmatprep.subr.mxu1 %v354_v17  ;;  %404 = vmatpush2.msra.mxu0 %v289_v18  ;;  %v332_v61 = vld [vmem:[%s1255_s17 + $0x308] sm:$0xff]  ;;  %v267_v62 = vld [vmem:[%s1255_s17 + $0x100] sm:$0xff]  ;;  %v222_v1 = vld [vmem:[#allocation2 + $0x18] sm:$0xff] }
  0x85   : > { %493 = vmatpush2.msra.mxu1 %v353_v19  ;;  %405 = vmatprep.subr.mxu0 %v288_v20  ;;  %v220_v63 = vld [vmem:[#allocation2 + $0x8] sm:$0xff]  ;;  %v331_v0 = vld [vmem:[%s1255_s17 + $0x300] sm:$0xff]  ;;  %v221_v3 = vld [vmem:[#allocation2 + $0x10] sm:$0xff] }
  0x86   : > { %494 = vmatprep.subr.mxu1 %v352_v21  ;;  %406 = vmatpush2.msra.mxu0 %v287_v22  ;;  %v219_v2 = vld [vmem:[#allocation2] sm:$0xff]  ;;  %v224_v4 = vld [vmem:[#allocation2 + $0x28] sm:$0xff]  ;;  %v226_v5 = vld [vmem:[#allocation2 + $0x38] sm:$0xff] }
  0x87   : > { %495 = vmatpush2.msra.mxu1 %v351_v23  ;;  %407 = vmatprep.subr.mxu0 %v286_v24  ;;  %v223_v6 = vld [vmem:[#allocation2 + $0x20] sm:$0xff]  ;;  %v225_v7 = vld [vmem:[#allocation2 + $0x30] sm:$0xff]  ;;  %v228_v8 = vld [vmem:[#allocation2 + $0x48] sm:$0xff] }
  0x88   : > { %496 = vmatprep.subr.mxu1 %v350_v25  ;;  %408 = vmatpush2.msra.mxu0 %v285_v26  ;;  %v230_v9 = vld [vmem:[#allocation2 + $0x58] sm:$0xff]  ;;  %v227_v10 = vld [vmem:[#allocation2 + $0x40] sm:$0xff]  ;;  %v229_v11 = vld [vmem:[#allocation2 + $0x50] sm:$0xff] }
  0x89   : > { %497 = vmatpush2.msra.mxu1 %v349_v27  ;;  %409 = vmatprep.subr.mxu0 %v284_v28  ;;  %v232_v12 = vld [vmem:[#allocation2 + $0x68] sm:$0xff]  ;;  %v234_v13 = vld [vmem:[#allocation2 + $0x78] sm:$0xff]  ;;  %v231_v14 = vld [vmem:[#allocation2 + $0x60] sm:$0xff] }
  0x8a   : > { %498 = vmatprep.subr.mxu1 %v348_v29  ;;  %410 = vmatpush2.msra.mxu0 %v283_v30  ;;  %v233_v15 = vld [vmem:[#allocation2 + $0x70] sm:$0xff] }
  0x8b   : > { %499 = vmatpush2.msra.mxu1 %v347_v31  ;;  %411 = vmatprep.subr.mxu0 %v282_v32 }
  0x8c   : > { %500 = vmatprep.subr.mxu1 %v346_v33  ;;  %412 = vmatpush2.msra.mxu0 %v281_v34 }
  0x8d   : > { %501 = vmatpush2.msra.mxu1 %v345_v35  ;;  %413 = vmatprep.subr.mxu0 %v280_v36 }
  0x8e   : > { %502 = vmatprep.subr.mxu1 %v344_v37  ;;  %414 = vmatpush2.msra.mxu0 %v279_v38 }
  0x8f   : > { %503 = vmatpush2.msra.mxu1 %v343_v39  ;;  %415 = vmatprep.subr.mxu0 %v278_v40 }
  0x90   : > { %504 = vmatprep.subr.mxu1 %v342_v41  ;;  %416 = vmatpush2.msra.mxu0 %v277_v42  ;;  %v541_v41 = vld [vmem:[#allocation5] sm:$0xff]  ;;  %v543_v42 = vld [vmem:[#allocation5 + $0x10] sm:$0xff] }
  0x91   : > { %505 = vmatpush2.msra.mxu1 %v341_v43  ;;  %417 = vmatprep.subr.mxu0 %v276_v44  ;;  %v542_v43 = vld [vmem:[#allocation5 + $0x8] sm:$0xff]  ;;  %v544_v44 = vld [vmem:[#allocation5 + $0x18] sm:$0xff] }
  0x92   : > { %506 = vmatprep.subr.mxu1 %v340_v45  ;;  %418 = vmatpush2.msra.mxu0 %v275_v46 }
  0x93   : > { %507 = vmatpush2.msra.mxu1 %v339_v47  ;;  %419 = vmatprep.subr.mxu0 %v274_v48 }
  0x94   : > { %508 = vmatprep.subr.mxu1 %v338_v49  ;;  %420 = vmatpush2.msra.mxu0 %v273_v50 }
  0x95   : > { %509 = vmatpush2.msra.mxu1 %v337_v51  ;;  %421 = vmatprep.subr.mxu0 %v272_v52 }
  0x96   : > { %510 = vmatprep.subr.mxu1 %v336_v53  ;;  %422 = vmatpush2.msra.mxu0 %v271_v54  ;;  %v651_v53 = vld [vmem:[%s650_s20] sm:$0xff] }
  0x97   : > { %511 = vmatpush2.msra.mxu1 %v335_v55  ;;  %423 = vmatprep.subr.mxu0 %v270_v56  ;;  %v655_v54 = vld [vmem:[%s650_s20 + $0x40] sm:$0xff]  ;;  %v652_v56 = vld [vmem:[%s650_s20 + $0x8] sm:$0xff] }
  0x98   : > { %512 = vmatprep.subr.mxu1 %v334_v57  ;;  %424 = vmatpush2.msra.mxu0 %v269_v58 }
  0x99   : > { %513 = vmatpush2.msra.mxu1 %v333_v59  ;;  %425 = vmatprep.subr.mxu0 %v268_v60  ;;  %v656_v59 = vld [vmem:[%s650_s20 + $0x48] sm:$0xff] }
  0x9a   : > { %514 = vmatprep.subr.mxu1 %v332_v61  ;;  %426 = vmatpush2.msra.mxu0 %v267_v62  ;;  %v653_v62 = vld [vmem:[%s650_s20 + $0x20] sm:$0xff] }
  0x9b   : > { %427 = vmatprep.mubr.f32.mxu0 %v220_v63  ;;  %515 = vmatpush2.msra.mxu1 %v331_v0 }
  0x9c   : > { %516 = vmatprep.mubr.f32.mxu1 %v222_v1  ;;  %428 = vmatmul.mubr.f32.vlgmr.msra.gmra.mxu0 %v219_v2  ;;  %v657_v1 = vld [vmem:[%s650_s20 + $0x60] sm:$0xff] }
  0x9d   : > { %517 = vmatmul.mubr.f32.vlgmr.msra.gmra.mxu1 %v221_v3  ;;  %433 = vmatprep.mubr.f32.mxu0 %v224_v4  ;;  %v654_v4 = vld [vmem:[%s650_s20 + $0x28] sm:$0xff] }
  0x9e   : > { %522 = vmatprep.mubr.f32.mxu1 %v226_v5 }
  0xa0   : > { %434 = vmatmul.mubr.f32.gmra.mxu0 %v223_v6 }
  0xa1   : > { %523 = vmatmul.mubr.f32.gmra.mxu1 %v225_v7  ;;  %439 = vmatprep.mubr.f32.mxu0 %v228_v8  ;;  %v658_v7 = vld [vmem:[%s650_s20 + $0x68] sm:$0xff] }
  0xa2   : > { %528 = vmatprep.mubr.f32.mxu1 %v230_v9 }
  0xa4   : > { %440 = vmatmul.mubr.f32.gmra.mxu0 %v227_v10 }
  0xa5   : > { %529 = vmatmul.mubr.f32.gmra.mxu1 %v229_v11  ;;  %445 = vmatprep.mubr.f32.mxu0 %v232_v12 }
  0xa6   : > { %534 = vmatprep.mubr.f32.mxu1 %v234_v13 }
  0xa8   : > { %446 = vmatmul.mubr.f32.gmra.mxu0 %v231_v14 }
  0xa9   : > { %535 = vmatmul.mubr.f32.gmra.mxu1 %v233_v15  ;;  %622 = vmatprep.mubr.f32.mxu0 %v1081_v16 }
  0xaa   : > { %634 = vmatprep.mubr.f32.mxu1 %v1081_v16 }
 0x15c   : > { %v429_v17 = vpop.f32.mrf.mxu0 }
 0x15d   : > { %v518_v18 = vpop.f32.mrf.mxu1 }
 0x15e   : > { %v431_v19 = vpop.f32.mrf.mxu0  ;;  %v519_v40 = vadd.f32 %v518_v18, %v429_v17 }
 0x15f   : > { %v520_v20 = vpop.f32.mrf.mxu1 }
 0x160   : > { %v435_v21 = vpop.f32.mrf.mxu0  ;;  %v521_v39 = vadd.f32 %v520_v20, %v431_v19 }
 0x161   : > { %v524_v22 = vpop.f32.mrf.mxu1 }
 0x162   : > { %v437_v23 = vpop.f32.mrf.mxu0  ;;  %v525_v38 = vadd.f32 %v524_v22, %v435_v21 }
 0x163   : > { %v526_v24 = vpop.f32.mrf.mxu1 }
 0x164   : > { %v441_v25 = vpop.f32.mrf.mxu0  ;;  %v527_v37 = vadd.f32 %v526_v24, %v437_v23 }
 0x165   : > { %v530_v26 = vpop.f32.mrf.mxu1 }
 0x166   : > { %v443_v27 = vpop.f32.mrf.mxu0  ;;  %v531_v36 = vadd.f32 %v530_v26, %v441_v25 }
 0x167   : > { %v532_v28 = vpop.f32.mrf.mxu1 }
 0x168   : > { %v447_v29 = vpop.f32.mrf.mxu0  ;;  %v533_v35 = vadd.f32 %v532_v28, %v443_v27 }
 0x169   : > { %v536_v30 = vpop.f32.mrf.mxu1 }
 0x16a   : > { %v449_v31 = vpop.f32.mrf.mxu0  ;;  %v537_v34 = vadd.f32 %v536_v30, %v447_v29 }
 0x16b   : > { %v538_v32 = vpop.f32.mrf.mxu1 }
 0x16c   : > { %v539_v33 = vadd.f32 %v538_v32, %v449_v31 }
 0x16e   : > { %582 = vmatprep.subr.mxu0 %v539_v33  ;;  %817 = vmatprep.subr.mxu1 %v539_v33 }
 0x16f   : > { %583 = vmatpush1.msra.mxu0 %v537_v34  ;;  %821 = vmatpush1.msra.mxu1 %v537_v34 }
 0x170   : > { %584 = vmatprep.subr.mxu0 %v533_v35  ;;  %818 = vmatprep.subr.mxu1 %v533_v35 }
 0x171   : > { %585 = vmatpush1.msra.mxu0 %v531_v36  ;;  %822 = vmatpush1.msra.mxu1 %v531_v36 }
 0x172   : > { %586 = vmatprep.subr.mxu0 %v527_v37  ;;  %819 = vmatprep.subr.mxu1 %v527_v37 }
 0x173   : > { %587 = vmatpush1.msra.mxu0 %v525_v38  ;;  %823 = vmatpush1.msra.mxu1 %v525_v38 }
 0x174   : > { %588 = vmatprep.subr.mxu0 %v521_v39  ;;  %820 = vmatprep.subr.mxu1 %v521_v39 }
 0x175   : > { %589 = vmatpush1.msra.mxu0 %v519_v40  ;;  %824 = vmatpush1.msra.mxu1 %v519_v40 }
 0x176   : > { %805 = vmatmul.mubr.msk.f32.vlgmr.msra.gmra.mxu0 %vm545_vm0, %v541_v41  ;;  %807 = vmatmul.mubr.msk.f32.vlgmr.msra.gmra.mxu1 %vm545_vm0, %v543_v42 }
 0x177   : > { %628 = vmatprep.mubr.f32.mxu0 %v1081_v16  ;;  %640 = vmatprep.mubr.f32.mxu1 %v1081_v16 }
 0x17a   : > { %806 = vmatmul.mubr.msk.f32.gmra.mxu0 %vm545_vm0, %v542_v43  ;;  %808 = vmatmul.mubr.msk.f32.gmra.mxu1 %vm545_vm0, %v544_v44 }
 0x236   : > { %v624_v45 = vpop.f32.mrf.mxu0  ;;  %v636_v46 = vpop.f32.mrf.mxu1 }
 0x237   : > { %902 = vtanh.f32 %v624_v45 }
 0x238   : > { %904 = vtanh.f32 %v636_v46  ;;  %v626_v47 = vpop.f32.mrf.mxu0  ;;  %v638_v48 = vpop.f32.mrf.mxu1 }
 0x239   : > { %906 = vtanh.f32 %v626_v47 }
 0x23a   : > { %908 = vtanh.f32 %v638_v48  ;;  %v630_v49 = vpop.f32.mrf.mxu0  ;;  %v642_v50 = vpop.f32.mrf.mxu1 }
 0x23b   : > { %910 = vtanh.f32 %v630_v49 }
 0x23c   : > { %912 = vtanh.f32 %v642_v50  ;;  %v632_v51 = vpop.f32.mrf.mxu0  ;;  %v644_v52 = vpop.f32.mrf.mxu1 }
 0x23d   : > { %914 = vtanh.f32 %v632_v51 }
 0x23e   : > { %916 = vtanh.f32 %v644_v52 }
 0x244   : > { %v903_v55 = vpop.eup %902 }
 0x245   : > { %v905_v57 = vpop.eup %904  ;;  %v667_v58 = vadd.f32 %v903_v55, %v651_v53 }
 0x246   : > { %v907_v60 = vpop.eup %906  ;;  %v671_v61 = vadd.f32 %v905_v57, %v655_v54 }
 0x247   : > { %v909_v63 = vpop.eup %908  ;;  %675 = vst [vmem:[%s215_s22] sm:$0xff] %v667_v58  ;;  %v668_v0 = vadd.f32 %v907_v60, %v652_v56 }
 0x248   : > { %v911_v2 = vpop.eup %910  ;;  %679 = vst [vmem:[%s215_s22 + $0x20] sm:$0xff] %v671_v61  ;;  %v672_v3 = vadd.f32 %v909_v63, %v656_v59 }
 0x249   : > { %v913_v5 = vpop.eup %912  ;;  %676 = vst [vmem:[%s215_s22 + $0x8] sm:$0xff] %v668_v0  ;;  %v669_v6 = vadd.f32 %v911_v2, %v653_v62 }
 0x24a   : > { %v915_v8 = vpop.eup %914  ;;  %680 = vst [vmem:[%s215_s22 + $0x28] sm:$0xff] %v672_v3  ;;  %v673_v9 = vadd.f32 %v913_v5, %v657_v1 }
 0x24b   : > { %v917_v10 = vpop.eup %916  ;;  %677 = vst [vmem:[%s215_s22 + $0x10] sm:$0xff] %v669_v6  ;;  %v670_v11 = vadd.f32 %v915_v8, %v654_v4 }
 0x24c   : > { %681 = vst [vmem:[%s215_s22 + $0x30] sm:$0xff] %v673_v9  ;;  %v674_v12 = vadd.f32 %v917_v10, %v658_v7 }
 0x24d   : > { %678 = vst [vmem:[%s215_s22 + $0x18] sm:$0xff] %v670_v11 }
 0x24e   : > { %682 = vst [vmem:[%s215_s22 + $0x38] sm:$0xff] %v674_v12 }
 0x24f   : > { %1011 = shalt.err (!%p1008_p0)
}
 0x250   : > { %s1012_s10 = scalar_lea.hbm %s1398_s30, 1024  ;;  %s1016_s17 = scalar_lea.hbm %s1446_s3, 2048 }
 0x251   : > { %p1013_p2 = scmp.ne.s32.totalorder %s1398_s30, %s1012_s10  ;;  %p1017_p6 = scmp.lt.s32.totalorder %s1398_s30, %s1446_s3 }
 0x252   : > { %p1018_p13 = scmp.lt.s32.totalorder %s1016_s17, %s1012_s10 }
 0x253   : > { %p1014_p3 = pnand %p1013_p2, %p1468_p11 }
 0x254   : > { %p1019_p8 = por %p1018_p13, %p1017_p6 }
 0x255   : > { %p1015_p7 = pneg %p1014_p3 }
 0x257   : > { %p1020_p4 = pnand %p1019_p8, %p1015_p7 }
 0x259   : > { %1023 = shalt.err (!%p1020_p4)
}
 0x25a   : > { %s1083_s4 = smov 256   ;;  %s1084_s19 = smov 512  }
 0x25b   : > { %s1085_s20 = smov 16  }
 0x25c   : > { %835 = dma.vmem_to_hbm [thread:$0]  (%p1468_p11), %s1400_s27, 1024, %s1398_s30, %s684_s16, %s1083_s4, %s1084_s19, %s1085_s20  }
 0x25d PF: > { %s712_s22 = sand.u32 1, %s1058_s12   ;;  %p1469_p12 = scmp.ne.s32.totalorder %s1456_s25, 0 }
 0x25e   : > { %p1470_p9 = scmp.ge.s32.totalorder %s1070_s15, 2  ;;  %s713_s11 = scalar_lea.sflag [#allocation4], %s712_s22 }
 0x260   : > { %p849_p10 = pnand %p1470_p9, %p1469_p12 }
 0x262   : > { %p850_p1 = pneg %p849_p10 }
 0x264   : > { %1053 = dma.done.wait (%p850_p1), %s713_s11, 1024  }
 0x265   : > { %1055 = vsyncadd (%p850_p1), %s713_s11, 4294966272  ;;  %p15_p5 = scmp.ge.s32.totalorder %s1131_s18, 4   ;;  %s1471_s12 = smov %s1062_s13 }
 0x266   : > { %s1472_s13 = smov %s1066_s14  ;;  %s1473_s14 = smov %s1143_s21 }
 0x267   : > { %s1474_s15 = smov %s1131_s18  ;;  %17 = sbr.rel (!%p15_p5) target bundleno = 7 (0x7), region = 85 }
 0x26c   :  { %718 = vsyncpa [#allocation3], 1 }
 0x26d   :  { %720 = vsyncpa [#allocation3 + $0x1], 1 }
 0x26e   :  { %721 = vsyncpa [#allocation6], 1 }
 0x26f   :  { %722 = vsyncpa [#allocation4], 1 }
 0x270   :  { %724 = vsyncpa [#allocation4 + $0x1], 1 }

</bundles_post_ra>
